<compile_context>
chip_gen: v7x
topology: tpu7x:2x2x1
jax: 0.10.0
libtpu: 0.0.40
codegen_flags: <defaults>
</compile_context>

<pallas_src>
import math

import jax
import jax.numpy as jnp
from jax.experimental import pallas as pl
from jax.experimental.pallas import tpu as pltpu


def _mlp_kernel(x_ref, wg_ref, wu_ref, wd_ref, o_ref, acc_ref):
    """One (tm tokens) x (tn intermediate columns) slab of the fused SwiGLU MLP."""
    k = pl.program_id(1)

    @pl.when(k == 0)
    def _():
        acc_ref[...] = jnp.zeros_like(acc_ref)

    x = x_ref[...]
    gate = jnp.dot(x, wg_ref[...], preferred_element_type=jnp.float32)
    up = jnp.dot(x, wu_ref[...], preferred_element_type=jnp.float32)
    act = gate * jax.nn.sigmoid(gate)            # SiLU kept in f32; sigmoid -> EUP slot
    temp = (act * up).astype(x.dtype)
    acc_ref[...] += jnp.dot(temp, wd_ref[...], preferred_element_type=jnp.float32)

    @pl.when(k == pl.num_programs(1) - 1)
    def _():
        o_ref[...] = acc_ref[...].astype(o_ref.dtype)


def _round_up(x, m):
    return ((x + m - 1) // m) * m


def _largest_aligned_divisor(dim, target, align):
    """Largest multiple of `align` that divides `dim` and is <= `target`; else `dim`."""
    if dim <= target or dim < align:
        return dim
    t = (min(target, dim) // align) * align
    while t >= align:
        if dim % t == 0:
            return t
        t -= align
    return dim


def _vmem_footprint_bytes(tm, tn, H, io_bytes):
    x_t = tm * H * io_bytes           # x token tile
    w_t = 2 * H * tn * io_bytes       # gate + up column tiles
    wd_t = tn * H * io_bytes          # down row tile
    o_t = tm * H * io_bytes           # output tile
    acc = tm * H * 4                  # f32 accumulator scratch (single-buffered)
    return 2 * (x_t + w_t + wd_t + o_t) + acc   # double-buffered in/out + scratch


def _default_vmem_budget_bytes():
    """~70% of physical VMEM; conservative 64 MiB (v7x-sized) fallback."""
    cap = None
    try:
        cap = pltpu.get_tpu_info().vmem_capacity_bytes
    except Exception:
        cap = None
    if not cap:
        cap = 64 * 1024 * 1024
    return int(cap * 0.70)


def _choose_tiles(M, H, I, io_bytes, budget):
    """Pick (tm, tn): maximize tm first (cuts weight re-reads), then tn."""
    m_pad = max(8, _round_up(M, 8))
    tm_options = [t for t in (1024, 512, 256, 128, 64, 32, 16, 8) if t <= m_pad]
    if not tm_options:
        tm_options = [m_pad]

    tn_options, seen = [], set()
    for target in (2048, 1024, 512, 256, 128):
        d = _largest_aligned_divisor(I, target, 128)
        if d not in seen:
            tn_options.append(d)
            seen.add(d)

    for tm_c in tm_options:
        for tn_c in tn_options:
            if _vmem_footprint_bytes(tm_c, tn_c, H, io_bytes) <= budget:
                return min(tm_c, M), tn_c
    # Nothing fits the budget: fall back to the smallest candidates.
    return min(tm_options[-1], M), tn_options[-1]


def mistral_mlp_pallas(hidden_state, gate_proj, up_proj, down_proj, *,
                       tm=None, tn=None, vmem_budget_bytes=None):
    """hidden_state: (B, S, H); gate/up_proj: (1, H, I); down_proj: (1, I, H)."""
    B, S, H = hidden_state.shape
    I = gate_proj.shape[-1]
    M = B * S
    dt = hidden_state.dtype
    io_bytes = jnp.dtype(dt).itemsize

    x2d = hidden_state.reshape(M, H)
    wg = gate_proj.reshape(H, I)
    wu = up_proj.reshape(H, I)
    wd = down_proj.reshape(I, H)

    budget = (vmem_budget_bytes if vmem_budget_bytes is not None
              else _default_vmem_budget_bytes())

    auto_tm, auto_tn = _choose_tiles(M, H, I, io_bytes, budget)
    if tm is None:
        tm = auto_tm
    if tn is None:
        tn = auto_tn
    tm = min(tm, M)
    tn = min(tn, I)
    assert I % tn == 0, "intermediate tile must divide intermediate_size"

    grid = (pl.cdiv(M, tm), I // tn)

    footprint = _vmem_footprint_bytes(tm, tn, H, io_bytes)
    vmem_limit = min(128 * 1024 * 1024,
                     max(32 * 1024 * 1024, int(footprint * 1.3) + (2 << 20)))

    cost = pl.CostEstimate(
        flops=6 * M * H * I,                       # gate + up + down GEMMs
        transcendentals=M * I,                     # sigmoid in silu
        bytes_accessed=(2 * M * H + 3 * H * I) * io_bytes,
    )

    # TODO(synk): optionally fuse gate+up into a single (H, 2*tn) weight tile via a
    # pre-concatenated parameter; skipped to avoid an extra per-call HBM concat.
    out2d = pl.pallas_call(
        _mlp_kernel,
        out_shape=jax.ShapeDtypeStruct((M, H), dt),
        grid_spec=pltpu.PrefetchScalarGridSpec(
            num_scalar_prefetch=0,
            grid=grid,
            in_specs=[
                pl.BlockSpec((tm, H), lambda i, k: (i, 0)),   # x token tile (resident over k)
                pl.BlockSpec((H, tn), lambda i, k: (0, k)),   # gate weight columns
                pl.BlockSpec((H, tn), lambda i, k: (0, k)),   # up weight columns
                pl.BlockSpec((tn, H), lambda i, k: (k, 0)),   # down weight rows
            ],
            out_specs=pl.BlockSpec((tm, H), lambda i, k: (i, 0)),
            scratch_shapes=[pltpu.VMEM((tm, H), jnp.float32)],
        ),
        compiler_params=pltpu.CompilerParams(
            dimension_semantics=("parallel", "arbitrary"),
            vmem_limit_bytes=vmem_limit,
        ),
        cost_estimate=cost,
    )(x2d, wg, wu, wd)

    return out2d.reshape(B, S, H)


def _reference_mlp(hidden_state, gate_proj, up_proj, down_proj):
    x = hidden_state.astype(jnp.float32)
    wg = gate_proj[0].astype(jnp.float32)
    wu = up_proj[0].astype(jnp.float32)
    wd = down_proj[0].astype(jnp.float32)
    gate = x @ wg
    up = x @ wu
    temp = (gate * jax.nn.sigmoid(gate)) * up
    return (temp @ wd).astype(hidden_state.dtype)


if __name__ == "__main__":
    # Small synthetic config: batch=2, seq=8, hidden=32, intermediate=64
    B, S, H, I = 2, 8, 32, 64

    key = jax.random.PRNGKey(0)
    kx, kg, ku, kd = jax.random.split(key, 4)

    hidden_state = jax.random.normal(kx, (B, S, H), dtype=jnp.float32)
    # uniform(-1, 1) / sqrt(fan_in), matching the PyTorch init shapes
    gate_proj = jax.random.uniform(kg, (1, H, I), minval=-1.0, maxval=1.0,
                                   dtype=jnp.float32) / math.sqrt(H)
    up_proj = jax.random.uniform(ku, (1, H, I), minval=-1.0, maxval=1.0,
                                 dtype=jnp.float32) / math.sqrt(H)
    down_proj = jax.random.uniform(kd, (1, I, H), minval=-1.0, maxval=1.0,
                                   dtype=jnp.float32) / math.sqrt(I)

    out = mistral_mlp_pallas(hidden_state, gate_proj, up_proj, down_proj)
    out = jax.block_until_ready(out)

    ref = _reference_mlp(hidden_state, gate_proj, up_proj, down_proj)
    assert out.shape == (B, S, H)
    assert jnp.allclose(out, ref, atol=1e-4, rtol=1e-4)

    print("KERNEL_OK")
</pallas_src>

<mosaic_0001>
module attributes {stable_mosaic.version = 11 : i64} {
  func.func @_mlp_kernel(%arg0: i32, %arg1: i32, %arg2: memref<16x32xf32, #tpu.memory_space<vmem>>, %arg3: memref<32x64xf32, #tpu.memory_space<vmem>>, %arg4: memref<32x64xf32, #tpu.memory_space<vmem>>, %arg5: memref<64x32xf32, #tpu.memory_space<vmem>>, %arg6: memref<16x32xf32, #tpu.memory_space<vmem>>, %arg7: memref<16x32xf32, #tpu.memory_space<vmem>>) attributes {dimension_semantics = [#tpu.dimension_semantics<parallel>, #tpu.dimension_semantics<arbitrary>], iteration_bounds = array<i64: 1, 1>, scalar_prefetch = 0 : i64, scratch_operands = 1 : i64, tpu.core_type = #tpu.core_type<tc>, window_params = [{transform_indices = @transform_0, window_bounds = array<i64: 16, 32>}, {transform_indices = @transform_1, window_bounds = array<i64: 32, 64>}, {transform_indices = @transform_2, window_bounds = array<i64: 32, 64>}, {transform_indices = @transform_3, window_bounds = array<i64: 64, 32>}, {transform_indices = @transform_4, window_bounds = array<i64: 16, 32>}]} {
    %c0_i32 = arith.constant 0 : i32
    %0 = arith.cmpi eq, %arg1, %c0_i32 : i32
    %1 = arith.extui %0 : i1 to i32
    %c0_i32_0 = arith.constant 0 : i32
    %2 = arith.cmpi ne, %1, %c0_i32_0 : i32
    scf.if %2 {
      %cst_17 = arith.constant 0.000000e+00 : f32
      %23 = vector.broadcast %cst_17 : f32 to vector<16x32xf32>
      %c0_18 = arith.constant 0 : index
      %c0_19 = arith.constant 0 : index
      %24 = vector.load %arg7[%c0_18, %c0_19] : memref<16x32xf32, #tpu.memory_space<vmem>>, vector<16x32xf32>
      tpu.vector_store %arg7[%c0_18, %c0_19], %23 {strides = array<i32>} : memref<16x32xf32, #tpu.memory_space<vmem>>, vector<16x32xf32>,
    } else {
    }
    %c0 = arith.constant 0 : index
    %c0_1 = arith.constant 0 : index
    %3 = vector.load %arg2[%c0, %c0_1] : memref<16x32xf32, #tpu.memory_space<vmem>>, vector<16x32xf32>
    %c0_2 = arith.constant 0 : index
    %c0_3 = arith.constant 0 : index
    %4 = vector.load %arg3[%c0_2, %c0_3] : memref<32x64xf32, #tpu.memory_space<vmem>>, vector<32x64xf32>
    %cst = arith.constant dense<0.000000e+00> : vector<16x64xf32>
    %5 = tpu.matmul %3, %4, %cst {dimension_numbers = #tpu.dot_dimension_numbers<[1], [0], [0], [1], [0, 0, 1, 1], [], []>} : vector<16x32xf32>, vector<32x64xf32>, vector<16x64xf32> -> vector<16x64xf32>
    %c0_4 = arith.constant 0 : index
    %c0_5 = arith.constant 0 : index
    %6 = vector.load %arg4[%c0_4, %c0_5] : memref<32x64xf32, #tpu.memory_space<vmem>>, vector<32x64xf32>
    %cst_6 = arith.constant dense<0.000000e+00> : vector<16x64xf32>
    %7 = tpu.matmul %3, %6, %cst_6 {dimension_numbers = #tpu.dot_dimension_numbers<[1], [0], [0], [1], [0, 0, 1, 1], [], []>} : vector<16x32xf32>, vector<32x64xf32>, vector<16x64xf32> -> vector<16x64xf32>
    %8 = arith.negf %5 : vector<16x64xf32>
    %9 = math.exp %8 : vector<16x64xf32>
    %cst_7 = arith.constant 1.000000e+00 : f32
    %10 = vector.broadcast %cst_7 : f32 to vector<16x64xf32>
    %11 = arith.addf %10, %9 : vector<16x64xf32>
    %12 = arith.divf %10, %11 : vector<16x64xf32>
    %13 = arith.mulf %5, %12 : vector<16x64xf32>
    %14 = arith.mulf %13, %7 : vector<16x64xf32>
    %c0_8 = arith.constant 0 : index
    %c0_9 = arith.constant 0 : index
    %15 = vector.load %arg7[%c0_8, %c0_9] : memref<16x32xf32, #tpu.memory_space<vmem>>, vector<16x32xf32>
    %c0_10 = arith.constant 0 : index
    %c0_11 = arith.constant 0 : index
    %16 = vector.load %arg5[%c0_10, %c0_11] : memref<64x32xf32, #tpu.memory_space<vmem>>, vector<64x32xf32>
    %cst_12 = arith.constant dense<0.000000e+00> : vector<16x32xf32>
    %17 = tpu.matmul %14, %16, %cst_12 {dimension_numbers = #tpu.dot_dimension_numbers<[1], [0], [0], [1], [0, 0, 1, 1], [], []>} : vector<16x64xf32>, vector<64x32xf32>, vector<16x32xf32> -> vector<16x32xf32>
    %18 = arith.addf %15, %17 : vector<16x32xf32>
    %c0_13 = arith.constant 0 : index
    %c0_14 = arith.constant 0 : index
    %19 = vector.load %arg7[%c0_13, %c0_14] : memref<16x32xf32, #tpu.memory_space<vmem>>, vector<16x32xf32>
    tpu.vector_store %arg7[%c0_13, %c0_14], %18 {strides = array<i32>} : memref<16x32xf32, #tpu.memory_space<vmem>>, vector<16x32xf32>,
    %c0_i32_15 = arith.constant 0 : i32
    %20 = arith.cmpi eq, %arg1, %c0_i32_15 : i32
    %21 = arith.extui %20 : i1 to i32
    %c0_i32_16 = arith.constant 0 : i32
    %22 = arith.cmpi ne, %21, %c0_i32_16 : i32
    scf.if %22 {
      %c0_17 = arith.constant 0 : index
      %c0_18 = arith.constant 0 : index
      %23 = vector.load %arg7[%c0_17, %c0_18] : memref<16x32xf32, #tpu.memory_space<vmem>>, vector<16x32xf32>
      %c0_19 = arith.constant 0 : index
      %c0_20 = arith.constant 0 : index
      %24 = vector.load %arg6[%c0_19, %c0_20] : memref<16x32xf32, #tpu.memory_space<vmem>>, vector<16x32xf32>
      tpu.vector_store %arg6[%c0_19, %c0_20], %23 {strides = array<i32>} : memref<16x32xf32, #tpu.memory_space<vmem>>, vector<16x32xf32>,
    } else {
    }
    return
  }
  func.func @transform_0(%arg0: i32, %arg1: i32) -> (i32, i32) {
    %c0_i32 = arith.constant 0 : i32
    %c0_i32_0 = arith.constant 0 : i32
    return %arg0, %c0_i32 : i32, i32
  }
  func.func @transform_1(%arg0: i32, %arg1: i32) -> (i32, i32) {
    %c0_i32 = arith.constant 0 : i32
    %c0_i32_0 = arith.constant 0 : i32
    return %c0_i32, %arg1 : i32, i32
  }
  func.func @transform_2(%arg0: i32, %arg1: i32) -> (i32, i32) {
    %c0_i32 = arith.constant 0 : i32
    %c0_i32_0 = arith.constant 0 : i32
    return %c0_i32, %arg1 : i32, i32
  }
  func.func @transform_3(%arg0: i32, %arg1: i32) -> (i32, i32) {
    %c0_i32 = arith.constant 0 : i32
    %c0_i32_0 = arith.constant 0 : i32
    return %arg1, %c0_i32 : i32, i32
  }
  func.func @transform_4(%arg0: i32, %arg1: i32) -> (i32, i32) {
    %c0_i32 = arith.constant 0 : i32
    %c0_i32_0 = arith.constant 0 : i32
    return %arg0, %c0_i32 : i32, i32
  }
}

</mosaic_0001>

<bundles_post_ra>
// kernel: tpu_custom_call.1
= control target key start
LH: loop header
LB: loop body
LE: loop exit
PB: predicated region body
PF: predicated region fallthrough
CT: control target
= control target key end

     0   :  { %vm22_vm0 = vcmask 261120   ;;  %s571_s0 = inlined_call_operand.vmem [shape: f32[16,32], index: 0, kind: input, shape index: {}]   ;;  %s572_s1 = inlined_call_operand.vmem [shape: f32[32,64], index: 1, kind: input, shape index: {}]   ;;  %s573_s2 = inlined_call_operand.vmem [shape: f32[32,64], index: 2, kind: input, shape index: {}]   ;;  %s574_s3 = inlined_call_operand.vmem [shape: f32[64,32], index: 3, kind: input, shape index: {}]   ;;  %s575_s4 = inlined_call_operand.hbm [shape: f32[16,32], index: 4, kind: output, shape index: {}]  }
   0x1   :  { %v27_v0 = vld [vmem:[%s572_s1] sm:$0xff]  ;;  %v28_v1 = vld [vmem:[%s572_s1 + $0x8] sm:$0xff]  ;;  %v29_v2 = vld [vmem:[%s572_s1 + $0x10] sm:$0xff] }
   0x2   :  { %v398_v3 = vpack.c.bf16 %v28_v1, %v27_v0  ;;  %v30_v4 = vld [vmem:[%s572_s1 + $0x18] sm:$0xff]  ;;  %v25_v5 = vld [vmem:[%s571_s0] sm:$0xff]  ;;  %v114_v8 = vld [vmem:[%s573_s2 + $0x8] sm:$0xff] }
   0x3   :  { %v402_v6 = vpack.c.bf16 %v30_v4, %v29_v2  ;;  %365 = vmatprep.mubr.msk.f32.mxu1 %vm22_vm0, %v25_v5  ;;  %v113_v7 = vld [vmem:[%s573_s2] sm:$0xff] }
   0x4   :  { %399 = vmatprep.subr.bf16.mxu1 %v398_v3 }
   0x5   :  { %9 = vsyncpa [#allocation4], 0  ;;  %401 = vmatpush3.bf16.msra.mxu1 %v398_v3  ;;  %v406_v9 = vpack.c.bf16 %v114_v8, %v113_v7  ;;  %v115_v10 = vld [vmem:[%s573_s2 + $0x10] sm:$0xff]  ;;  %v116_v11 = vld [vmem:[%s573_s2 + $0x18] sm:$0xff]  ;;  %v466_v26 = vmov 0.0   ;;  %vm218_vm1 = vcmask 523264  }
   0x6   :  { %403 = vmatprep.subr.bf16.mxu1 %v402_v6  ;;  %v26_v12 = vld [vmem:[%s571_s0 + $0x8] sm:$0xff]  ;;  %v410_v13 = vpack.c.bf16 %v116_v11, %v115_v10  ;;  %v210_v14 = vld [vmem:[%s574_s3] sm:$0xff]  ;;  %v212_v17 = vld [vmem:[%s574_s3 + $0x10] sm:$0xff]  ;;  %24 = vst.msk [vmem:[#allocation2 + $0x8] sm:$0xff] %vm22_vm0, %v466_v26 }
   0x7   :  { %v211_v15 = vld [vmem:[%s574_s3 + $0x8] sm:$0xff]  ;;  %v213_v18 = vld [vmem:[%s574_s3 + $0x18] sm:$0xff]  ;;  %v214_v20 = vld [vmem:[%s574_s3 + $0x20] sm:$0xff]  ;;  %23 = vst.msk [vmem:[#allocation2] sm:$0xff] %vm22_vm0, %v466_v26 }
   0x8   :  { %v414_v16 = vpack.c.bf16 %v211_v15, %v210_v14  ;;  %v418_v19 = vpack.c.bf16 %v213_v18, %v212_v17  ;;  %v215_v21 = vld [vmem:[%s574_s3 + $0x28] sm:$0xff]  ;;  %v216_v23 = vld [vmem:[%s574_s3 + $0x30] sm:$0xff]  ;;  %v217_v24 = vld [vmem:[%s574_s3 + $0x38] sm:$0xff]  ;;  %s467_s3 = smov [#allocation3]  }
   0x9   :  { %405 = vmatpush3.bf16.msra.mxu1 %v402_v6  ;;  %v422_v22 = vpack.c.bf16 %v215_v21, %v214_v20  ;;  %v426_v25 = vpack.c.bf16 %v217_v24, %v216_v23  ;;  %s316_s22 = sshll.u32 %s467_s3, 4  ;;  %s317_s22 = int_to_ptr.vmem [resolvable:$true] %s316_s22 }
   0xa   :  { %407 = vmatprep.subr.bf16.mxu1 %v406_v9  ;;  %415 = vmatprep.subr.bf16.mxu0 %v414_v16  ;;  %s442_s23 = scalar_lea.vmem %s317_s22, 256  ;;  %p447_p1 = scmp.lt.s32.totalorder %s317_s22, %s317_s22 }
   0xb   :  { %417 = vmatpush3.bf16.msra.mxu0 %v414_v16  ;;  %p443_p0 = scmp.ne.s32.totalorder %s317_s22, %s442_s23  ;;  %p448_p2 = scmp.lt.s32.totalorder %s442_s23, %s442_s23 }
   0xc   :  { %366 = vmatmul.mubr.msk.f32.vlgmr.msra.gmra.mrb[0].mxu1 %vm22_vm0, %v26_v12  ;;  %419 = vmatprep.subr.bf16.mxu0 %v418_v19 }
   0xd   :  { %409 = vmatpush3.bf16.msra.mxu1 %v406_v9  ;;  %376 = vmatprep.mubr.msk.f32.mxu1 %vm22_vm0, %v25_v5  ;;  %v209_v43 = vld [vmem:[#allocation2 + $0x8] sm:$0xff]  ;;  %p449_p3 = por %p448_p2, %p447_p1 }
   0xe   :  { %411 = vmatprep.subr.bf16.mxu1 %v410_v13  ;;  %v208_v44 = vld [vmem:[#allocation2] sm:$0xff] }
   0xf   :  { %421 = vmatpush3.bf16.msra.mxu0 %v418_v19  ;;  %p450_p4 = pnand %p449_p3, %p443_p0 }
  0x10   :  { %423 = vmatprep.subr.bf16.mxu0 %v422_v22 }
  0x11   :  { %413 = vmatpush3.bf16.msra.mxu1 %v410_v13 }
  0x13   :  { %425 = vmatpush3.bf16.msra.mxu0 %v422_v22 }
  0x14   :  { %377 = vmatmul.mubr.msk.f32.vlgmr.msra.gmra.mrb[2].mxu1 %vm22_vm0, %v26_v12  ;;  %427 = vmatprep.subr.bf16.mxu0 %v426_v25 }
  0x17   :  { %429 = vmatpush3.bf16.msra.mxu0 %v426_v25 }
  0xdf   :  { %v367_v27 = vpop.f32.mrb[0].mxu1 }
  0xe0   :  { %v332_v28 = vmul.f32 -1.442695, %v367_v27  ;;  %v104_v29 = vpop.f32.mrb[1].mxu1 }
  0xe1   :  { %v331_v30 = vmul.f32 -1.442695, %v104_v29 }
  0xe2   :  { %434 = vpow2.f32 %v332_v28 }
  0xe3   :  { %436 = vpow2.f32 %v331_v30 }
  0xe7   :  { %v378_v31 = vpop.f32.mrb[2].mxu1 }
  0xe8   :  { %v183_v32 = vpop.f32.mrb[3].mxu1 }
  0xec   :  { %v435_v33 = vpop.eup %434 }
  0xed   :  { %v437_v34 = vpop.eup %436  ;;  %v199_v35 = vadd.f32 1.0, %v435_v33 }
  0xee   :  { %v198_v36 = vadd.f32 1.0, %v437_v34 }
  0xef   :  { %438 = vrcp.f32 %v199_v35 }
  0xf0   :  { %440 = vrcp.f32 %v198_v36 }
  0xf9   :  { %v439_v37 = vpop.eup %438 }
  0xfa   :  { %v441_v38 = vpop.eup %440  ;;  %v205_v39 = vmul.f32 %v439_v37, %v367_v27 }
  0xfb   :  { %v204_v40 = vmul.f32 %v441_v38, %v104_v29 }
  0xfc   :  { %v207_v41 = vmul.f32 %v378_v31, %v205_v39 }
  0xfd   :  { %v206_v42 = vmul.f32 %v204_v40, %v183_v32 }
  0xff   :  { %395 = vmatprep.mubr.msk.f32.mxu0 %vm218_vm1, %v206_v42 }
 0x100   :  { %396 = vmatmul.mubr.msk.f32.vlgmr.msra.gmra.mrb[0].mxu0 %vm218_vm1, %v207_v41 }
 0x1d3   :  { %v397_v45 = vpop.f32.mrb[0].mxu0 }
 0x1d4   :  { %v301_v46 = vadd.f32 %v397_v45, %v209_v43  ;;  %v291_v47 = vpop.f32.mrb[1].mxu0 }
 0x1d5   :  { %v300_v48 = vadd.f32 %v291_v47, %v208_v44 }
 0x1d6   :  { %303 = vst.msk [vmem:[#allocation2 + $0x8] sm:$0xff] %vm22_vm0, %v301_v46 }
 0x1d7   :  { %302 = vst.msk [vmem:[#allocation2] sm:$0xff] %vm22_vm0, %v300_v48 }
 0x1dd   :  { %v308_v49 = vld [vmem:[#allocation2 + $0x8] sm:$0xff] }
 0x1de   :  { %v307_v50 = vld [vmem:[#allocation2] sm:$0xff]  ;;  %310 = vst.msk [vmem:[#allocation3 + $0x8] sm:$0xff] %vm22_vm0, %v308_v49 }
 0x1df   :  { %309 = vst.msk [vmem:[#allocation3] sm:$0xff] %vm22_vm0, %v307_v50 }
 0x1e0   :  { %453 = shalt.err (!%p450_p4)
}
 0x1e1   :  { %s454_s26 = scalar_lea.hbm %s575_s4, 256 }
 0x1e2   :  { %p455_p5 = scmp.ne.s32.totalorder %s575_s4, %s454_s26  ;;  %p458_p6 = scmp.lt.u32.totalorder %s454_s26, %s575_s4 }
 0x1e4   :  { %p460_p7 = pnand %p458_p6, %p455_p5 }
 0x1e6   :  { %463 = shalt.err (!%p460_p7)
}
 0x1e7   :  { %s468_s30 = smov 128   ;;  %s469_s5 = smov 8  }
 0x1e8   :  { %322 = dma.vmem_to_hbm [thread:$0]  %s317_s22, 256, %s575_s4, [#allocation4], %s468_s30, %s468_s30, %s469_s5  }
 0x1e9   :  { %464 = dma.done.wait [#allocation4], 256  }
 0x1ea   :  { %465 = vsyncadd [#allocation4], 4294967040 }
 0x1eb   :  { %326 = vsyncpa [#allocation4], 1 }

</bundles_post_ra>
